<compile_context>
chip_gen: v7x
topology: tpu7x:2x2x1
jax: 0.10.0
libtpu: 0.0.40
codegen_flags: <defaults>
</compile_context>

<pallas_src>
import functools

import jax
import jax.numpy as jnp
from jax import lax
from jax.experimental import pallas as pl
from jax.experimental.pallas import tpu as pltpu

# Older JAX releases expose the TPU compiler params under a different name.
_CompilerParams = getattr(pltpu, "CompilerParams", None) or getattr(pltpu, "TPUCompilerParams")

_MiB = 1024 * 1024


def _vmem_limit_bytes():
    """Generation-aware scoped-VMEM limit: ~3/4 of physical, clamped to [32, 96] MiB."""
    try:
        info_fn = getattr(pltpu, "get_tpu_info", None)
        if info_fn is not None:
            cap = int(info_fn().vmem_capacity_bytes)
            return max(32 * _MiB, min(96 * _MiB, cap * 3 // 4))
    except Exception:
        pass
    return 48 * _MiB


def _im2col_slab(x_cl, *, L, K, Cin, dilation, pad):
    """(Cin, L) -> (K*Cin, L) bf16 im2col slab; the K taps are stacked on the sublane axis.

    x is cast to bf16 BEFORE the halo pad / tap slices so the VPU cast runs once per element
    (not K times) and the halo + slab live in VMEM at half width.
    """
    xb = x_cl.astype(jnp.bfloat16)
    if pad > 0:
        halo = jnp.zeros((Cin, pad), dtype=jnp.bfloat16)
        xp = jnp.concatenate([halo, xb, halo], axis=1)          # zero halo in VMEM only
    else:
        xp = xb
    taps = [xp[:, k * dilation:k * dilation + L] for k in range(K)]   # static lane slices
    return taps[0] if K == 1 else jnp.concatenate(taps, axis=0)


def _conv_stats_kernel(x_ref, w_ref, mean_ref, m2_ref, *, TB, L, K, Cin, dilation, pad):
    """Pass 1 (stats only): per-sequence channel mean and centered sum-of-squares of the conv.

    x_ref    : (TB, Cin, L)   input block (TB sequences, NCL)
    w_ref    : (Cp8, K*Cin)   bf16 im2col weight (Cout padded to a sublane multiple)
    mean_ref : (TB, Cp8, 1)   per-sequence mean over L
    m2_ref   : (TB, Cp8, 1)   per-sequence centered sum of squares over L
    The conv bias shifts the BN mean only (it does not change the variance) and is folded into
    the BN shift in the wrapper, so it is not needed here.
    """
    w = w_ref[...]
    inv_l = 1.0 / L
    for b in range(TB):                                         # static, fully unrolled
        slab = _im2col_slab(x_ref[b], L=L, K=K, Cin=Cin, dilation=dilation, pad=pad)
        acc = jnp.dot(w, slab, preferred_element_type=jnp.float32)   # (Cp8, L) f32 on the MXU
        m = jnp.sum(acc, axis=1, keepdims=True) * inv_l               # (Cp8, 1)
        d = acc - m
        mean_ref[b] = m
        m2_ref[b] = jnp.sum(d * d, axis=1, keepdims=True)


def _conv_bn_lrelu_kernel(x_ref, w_ref, scale_ref, shift_ref, o_ref, *,
                          TB, L, K, Cin, Cout, Cp8, dilation, pad, neg_slope):
    """Pass 2: recompute the conv, apply the pre-folded BN scale/shift + LeakyReLU.

    x_ref     : (TB, Cin, L)
    w_ref     : (Cp8, K*Cin)  bf16
    scale_ref : (Cp8, 1) f32  gamma / sqrt(var + eps)
    shift_ref : (Cp8, 1) f32  beta + (bias - mean) * scale   (conv bias folded in)
    o_ref     : (TB, Cout, L) NCL output block — unpadded, no wrapper transpose/slice needed
    """
    w = w_ref[...]
    scale = scale_ref[...]
    shift = shift_ref[...]
    for b in range(TB):
        slab = _im2col_slab(x_ref[b], L=L, K=K, Cin=Cin, dilation=dilation, pad=pad)
        acc = jnp.dot(w, slab, preferred_element_type=jnp.float32)    # (Cp8, L) f32
        z = acc * scale + shift                                       # fused BN (f32 VPU)
        z = jnp.where(z >= 0, z, neg_slope * z)                       # LeakyReLU(0.2)
        if Cp8 != Cout:
            z = z[:Cout]
        o_ref[b] = z.astype(o_ref.dtype)


def temporal_conv1d(x_ncl, weight, bias, gamma, beta, *,
                    kernel_size=3, stride=1, dilation=1, eps=1e-5, neg_slope=0.2):
    """Forward of TemporalConv1D. x_ncl: (N, Cin, L) f32; weight: (Cout, Cin, K);
    bias/gamma/beta: (Cout,). Returns (N, Cout, L) f32 (PyTorch layout)."""
    assert stride == 1, "kernel implemented for stride=1 (module default)"
    N, Cin, L = x_ncl.shape
    Cout, _, K = weight.shape
    assert K == kernel_size
    assert (K - 1) * dilation % 2 == 0, "'same'-length conv requires (K-1)*dilation even"
    pad = (K - 1) * dilation // 2

    # Pad Cout to a sublane multiple for the matmul lhs only; the HBM output stays unpadded.
    Cp8 = max(8, ((Cout + 7) // 8) * 8)

    x = x_ncl.astype(jnp.float32)                                        # NCL, no transpose
    # slab rows are ordered (k, cin) -> weight rows must be W2[co, k*Cin + cin] = weight[co, cin, k]
    w2 = jnp.transpose(weight, (0, 2, 1)).reshape(Cout, K * Cin)
    w2 = jnp.pad(w2, ((0, Cp8 - Cout), (0, 0))).astype(jnp.bfloat16)     # (Cp8, K*Cin) bf16

    # TB sequences per grid step (largest divisor of N up to 8) to amortize per-step overhead.
    TB = 1
    for cand in range(min(N, 8), 0, -1):
        if N % cand == 0:
            TB = cand
            break
    NB = N // TB

    cparams = _CompilerParams(dimension_semantics=("parallel",),
                              vmem_limit_bytes=_vmem_limit_bytes())

    # ---- Pass 1: conv statistics only (tiny outputs; no f32 intermediate round-trip) ----
    stats_kernel = functools.partial(_conv_stats_kernel, TB=TB, L=L, K=K, Cin=Cin,
                                     dilation=dilation, pad=pad)
    means, m2s = pl.pallas_call(
        stats_kernel,
        grid=(NB,),
        in_specs=[
            pl.BlockSpec((TB, Cin, L), lambda n: (n, 0, 0)),
            pl.BlockSpec((Cp8, K * Cin), lambda n: (0, 0)),     # tiny constant weight block
        ],
        out_specs=(
            pl.BlockSpec((TB, Cp8, 1), lambda n: (n, 0, 0)),
            pl.BlockSpec((TB, Cp8, 1), lambda n: (n, 0, 0)),
        ),
        out_shape=(
            jax.ShapeDtypeStruct((N, Cp8, 1), jnp.float32),
            jax.ShapeDtypeStruct((N, Cp8, 1), jnp.float32),
        ),
        compiler_params=cparams,
    )(x, w2)

    # ---- BN finalization hoisted out of the per-block kernel (tiny (Cp8, 1) arrays) ----
    bias_p = jnp.pad(bias, (0, Cp8 - Cout)).reshape(Cp8, 1).astype(jnp.float32)
    gamma_p = jnp.pad(gamma, (0, Cp8 - Cout)).reshape(Cp8, 1).astype(jnp.float32)
    beta_p = jnp.pad(beta, (0, Cp8 - Cout)).reshape(Cp8, 1).astype(jnp.float32)

    count = float(N * L)
    mean_acc = jnp.mean(means, axis=0)                                   # (Cp8, 1) global mean
    m2 = jnp.sum(m2s + L * (means - mean_acc) ** 2, axis=0)              # parallel-variance combine
    var = m2 / count                                                     # biased (training mode)
    mean_y = mean_acc + bias_p                                           # BN sees conv output + bias
    scale = gamma_p * lax.rsqrt(var + eps)
    shift = beta_p + (bias_p - mean_y) * scale                           # conv bias folded into shift

    # ---- Pass 2: recompute conv, fused BN + LeakyReLU, unpadded NCL output ----
    bn_kernel = functools.partial(_conv_bn_lrelu_kernel, TB=TB, L=L, K=K, Cin=Cin,
                                  Cout=Cout, Cp8=Cp8, dilation=dilation, pad=pad,
                                  neg_slope=neg_slope)
    out = pl.pallas_call(
        bn_kernel,
        grid=(NB,),
        in_specs=[
            pl.BlockSpec((TB, Cin, L), lambda n: (n, 0, 0)),
            pl.BlockSpec((Cp8, K * Cin), lambda n: (0, 0)),
            pl.BlockSpec((Cp8, 1), lambda n: (0, 0)),
            pl.BlockSpec((Cp8, 1), lambda n: (0, 0)),
        ],
        out_specs=pl.BlockSpec((TB, Cout, L), lambda n: (n, 0, 0)),
        out_shape=jax.ShapeDtypeStruct((N, Cout, L), jnp.float32),
        compiler_params=cparams,
    )(x, w2, scale, shift)

    # TODO(synk): nn.BatchNorm1d running_mean/running_var (momentum) buffer updates are not
    # modeled; only the training-mode normalization of the current batch is computed.
    # TODO(synk): for very long sequences (per-sequence blocks near the v7x 64 MiB VMEM budget)
    # add an L-tiling grid axis with halo handling; unnecessary for the shapes exercised here.
    return out


def _reference(x_ncl, weight, bias, gamma, beta, *, dilation=1, eps=1e-5, neg_slope=0.2):
    """Pure-JAX reference with the same numerics as the kernel (bf16 conv operands,
    f32 accumulation, f32 BN/LeakyReLU) for tight verification."""
    K = weight.shape[-1]
    pad = (K - 1) * dilation // 2
    y = lax.conv_general_dilated(
        x_ncl.astype(jnp.bfloat16), weight.astype(jnp.bfloat16),
        window_strides=(1,), padding=[(pad, pad)], rhs_dilation=(dilation,),
        dimension_numbers=("NCH", "OIH", "NCH"),
        preferred_element_type=jnp.float32)
    y = y + bias[None, :, None]
    mean = jnp.mean(y, axis=(0, 2), keepdims=True)
    var = jnp.mean((y - mean) ** 2, axis=(0, 2), keepdims=True)
    y = (y - mean) * lax.rsqrt(var + eps)
    y = y * gamma[None, :, None] + beta[None, :, None]
    return jnp.where(y >= 0, y, neg_slope * y)


if __name__ == "__main__":
    # Small shapes consistent with the module: batch=2, in_channels=4, out_channels=8,
    # sequence length L=16, kernel_size=3.
    N, Cin, Cout, L, K = 2, 4, 8, 16, 3

    key = jax.random.PRNGKey(0)
    kx, kw, kb = jax.random.split(key, 3)

    x = jax.random.normal(kx, (N, Cin, L), dtype=jnp.float32)

    # Deterministic Conv1d-style init: U(-bound, bound), bound = 1/sqrt(Cin*K)
    bound = float((Cin * K) ** -0.5)
    weight = jax.random.uniform(kw, (Cout, Cin, K), jnp.float32, -bound, bound)
    bias = jax.random.uniform(kb, (Cout,), jnp.float32, -bound, bound)
    # BatchNorm1d default init
    gamma = jnp.ones((Cout,), jnp.float32)
    beta = jnp.zeros((Cout,), jnp.float32)

    out = temporal_conv1d(x, weight, bias, gamma, beta,
                          kernel_size=K, stride=1, dilation=1)
    out = jax.block_until_ready(out)

    ref = _reference(x, weight, bias, gamma, beta, dilation=1)
    assert out.shape == (N, Cout, L), out.shape
    max_err = float(jnp.max(jnp.abs(out - ref)))
    assert max_err < 1e-3, f"mismatch vs reference: max abs err {max_err}"

    print("KERNEL_OK")
</pallas_src>

<mosaic_0001>
module attributes {stable_mosaic.version = 11 : i64} {
  func.func @_conv_stats_kernel(%arg0: i32, %arg1: memref<2x4x16xf32, #tpu.memory_space<vmem>>, %arg2: memref<8x12xbf16, #tpu.memory_space<vmem>>, %arg3: memref<2x8x1xf32, #tpu.memory_space<vmem>>, %arg4: memref<2x8x1xf32, #tpu.memory_space<vmem>>) attributes {dimension_semantics = [#tpu.dimension_semantics<parallel>], iteration_bounds = array<i64: 1>, scalar_prefetch = 0 : i64, scratch_operands = 0 : i64, tpu.core_type = #tpu.core_type<tc>, window_params = [{transform_indices = @transform_0, window_bounds = array<i64: 2, 4, 16>}, {pipeline_mode = #tpu.pipeline_mode<synchronous>, transform_indices = @transform_1, window_bounds = array<i64: 8, 12>}, {transform_indices = @transform_2, window_bounds = array<i64: 2, 8, 1>}, {transform_indices = @transform_3, window_bounds = array<i64: 2, 8, 1>}]} {
    %c0 = arith.constant 0 : index
    %c0_0 = arith.constant 0 : index
    %0 = vector.load %arg2[%c0, %c0_0] : memref<8x12xbf16, #tpu.memory_space<vmem>>, vector<8x12xbf16>
    %c0_1 = arith.constant 0 : index
    %c0_2 = arith.constant 0 : index
    %c0_3 = arith.constant 0 : index
    %1 = vector.load %arg1[%c0_1, %c0_2, %c0_3] : memref<2x4x16xf32, #tpu.memory_space<vmem>>, vector<1x4x16xf32>
    %2 = vector.shape_cast %1 : vector<1x4x16xf32> to vector<4x16xf32>
    %3 = arith.truncf %2 : vector<4x16xf32> to vector<4x16xbf16>
    %cst = arith.constant 0.000000e+00 : bf16
    %4 = vector.broadcast %cst : bf16 to vector<4x1xbf16>
    %5 = tpu.concatenate %4, %3, %4 in 1 : vector<4x1xbf16>, vector<4x16xbf16>, vector<4x1xbf16> -> vector<4x18xbf16>
    %6 = vector.extract_strided_slice %5 {offsets = [0, 0], sizes = [4, 16], strides = [1, 1]} : vector<4x18xbf16> to vector<4x16xbf16>
    %7 = vector.extract_strided_slice %5 {offsets = [0, 1], sizes = [4, 16], strides = [1, 1]} : vector<4x18xbf16> to vector<4x16xbf16>
    %8 = vector.extract_strided_slice %5 {offsets = [0, 2], sizes = [4, 16], strides = [1, 1]} : vector<4x18xbf16> to vector<4x16xbf16>
    %9 = tpu.concatenate %6, %7, %8 in 0 : vector<4x16xbf16>, vector<4x16xbf16>, vector<4x16xbf16> -> vector<12x16xbf16>
    %cst_4 = arith.constant dense<0.000000e+00> : vector<8x16xf32>
    %10 = tpu.matmul %0, %9, %cst_4 {dimension_numbers = #tpu.dot_dimension_numbers<[1], [0], [0], [1], [0, 0, 1, 1], [], []>} : vector<8x12xbf16>, vector<12x16xbf16>, vector<8x16xf32> -> vector<8x16xf32>
    %cst_5 = arith.constant dense<0.000000e+00> : vector<8xf32>
    %11 = vector.multi_reduction <add>, %10, %cst_5 [1] : vector<8x16xf32> to vector<8xf32>
    %12 = vector.shape_cast %11 : vector<8xf32> to vector<8x1xf32>
    %cst_6 = arith.constant 6.250000e-02 : f32
    %13 = vector.broadcast %cst_6 : f32 to vector<8x1xf32>
    %14 = arith.mulf %12, %13 : vector<8x1xf32>
    %15 = vector.broadcast %14 : vector<8x1xf32> to vector<8x16xf32>
    %16 = arith.subf %10, %15 : vector<8x16xf32>
    %c0_7 = arith.constant 0 : index
    %c0_8 = arith.constant 0 : index
    %c0_9 = arith.constant 0 : index
    %17 = vector.load %arg3[%c0_7, %c0_8, %c0_9] : memref<2x8x1xf32, #tpu.memory_space<vmem>>, vector<1x8x1xf32>
    %18 = vector.shape_cast %17 : vector<1x8x1xf32> to vector<8x1xf32>
    %19 = vector.shape_cast %14 : vector<8x1xf32> to vector<1x8x1xf32>
    tpu.vector_store %arg3[%c0_7, %c0_8, %c0_9], %19 {strides = array<i32>} : memref<2x8x1xf32, #tpu.memory_space<vmem>>, vector<1x8x1xf32>,
    %20 = arith.mulf %16, %16 : vector<8x16xf32>
    %cst_10 = arith.constant dense<0.000000e+00> : vector<8xf32>
    %21 = vector.multi_reduction <add>, %20, %cst_10 [1] : vector<8x16xf32> to vector<8xf32>
    %22 = vector.shape_cast %21 : vector<8xf32> to vector<8x1xf32>
    %c0_11 = arith.constant 0 : index
    %c0_12 = arith.constant 0 : index
    %c0_13 = arith.constant 0 : index
    %23 = vector.load %arg4[%c0_11, %c0_12, %c0_13] : memref<2x8x1xf32, #tpu.memory_space<vmem>>, vector<1x8x1xf32>
    %24 = vector.shape_cast %23 : vector<1x8x1xf32> to vector<8x1xf32>
    %25 = vector.shape_cast %22 : vector<8x1xf32> to vector<1x8x1xf32>
    tpu.vector_store %arg4[%c0_11, %c0_12, %c0_13], %25 {strides = array<i32>} : memref<2x8x1xf32, #tpu.memory_space<vmem>>, vector<1x8x1xf32>,
    %c1 = arith.constant 1 : index
    %c0_14 = arith.constant 0 : index
    %c0_15 = arith.constant 0 : index
    %26 = vector.load %arg1[%c1, %c0_14, %c0_15] : memref<2x4x16xf32, #tpu.memory_space<vmem>>, vector<1x4x16xf32>
    %27 = vector.shape_cast %26 : vector<1x4x16xf32> to vector<4x16xf32>
    %28 = arith.truncf %27 : vector<4x16xf32> to vector<4x16xbf16>
    %cst_16 = arith.constant 0.000000e+00 : bf16
    %29 = vector.broadcast %cst_16 : bf16 to vector<4x1xbf16>
    %30 = tpu.concatenate %29, %28, %29 in 1 : vector<4x1xbf16>, vector<4x16xbf16>, vector<4x1xbf16> -> vector<4x18xbf16>
    %31 = vector.extract_strided_slice %30 {offsets = [0, 0], sizes = [4, 16], strides = [1, 1]} : vector<4x18xbf16> to vector<4x16xbf16>
    %32 = vector.extract_strided_slice %30 {offsets = [0, 1], sizes = [4, 16], strides = [1, 1]} : vector<4x18xbf16> to vector<4x16xbf16>
    %33 = vector.extract_strided_slice %30 {offsets = [0, 2], sizes = [4, 16], strides = [1, 1]} : vector<4x18xbf16> to vector<4x16xbf16>
    %34 = tpu.concatenate %31, %32, %33 in 0 : vector<4x16xbf16>, vector<4x16xbf16>, vector<4x16xbf16> -> vector<12x16xbf16>
    %cst_17 = arith.constant dense<0.000000e+00> : vector<8x16xf32>
    %35 = tpu.matmul %0, %34, %cst_17 {dimension_numbers = #tpu.dot_dimension_numbers<[1], [0], [0], [1], [0, 0, 1, 1], [], []>} : vector<8x12xbf16>, vector<12x16xbf16>, vector<8x16xf32> -> vector<8x16xf32>
    %cst_18 = arith.constant dense<0.000000e+00> : vector<8xf32>
    %36 = vector.multi_reduction <add>, %35, %cst_18 [1] : vector<8x16xf32> to vector<8xf32>
    %37 = vector.shape_cast %36 : vector<8xf32> to vector<8x1xf32>
    %cst_19 = arith.constant 6.250000e-02 : f32
    %38 = vector.broadcast %cst_19 : f32 to vector<8x1xf32>
    %39 = arith.mulf %37, %38 : vector<8x1xf32>
    %40 = vector.broadcast %39 : vector<8x1xf32> to vector<8x16xf32>
    %41 = arith.subf %35, %40 : vector<8x16xf32>
    %c1_20 = arith.constant 1 : index
    %c0_21 = arith.constant 0 : index
    %c0_22 = arith.constant 0 : index
    %42 = vector.load %arg3[%c1_20, %c0_21, %c0_22] : memref<2x8x1xf32, #tpu.memory_space<vmem>>, vector<1x8x1xf32>
    %43 = vector.shape_cast %42 : vector<1x8x1xf32> to vector<8x1xf32>
    %44 = vector.shape_cast %39 : vector<8x1xf32> to vector<1x8x1xf32>
    tpu.vector_store %arg3[%c1_20, %c0_21, %c0_22], %44 {strides = array<i32>} : memref<2x8x1xf32, #tpu.memory_space<vmem>>, vector<1x8x1xf32>,
    %45 = arith.mulf %41, %41 : vector<8x16xf32>
    %cst_23 = arith.constant dense<0.000000e+00> : vector<8xf32>
    %46 = vector.multi_reduction <add>, %45, %cst_23 [1] : vector<8x16xf32> to vector<8xf32>
    %47 = vector.shape_cast %46 : vector<8xf32> to vector<8x1xf32>
    %c1_24 = arith.constant 1 : index
    %c0_25 = arith.constant 0 : index
    %c0_26 = arith.constant 0 : index
    %48 = vector.load %arg4[%c1_24, %c0_25, %c0_26] : memref<2x8x1xf32, #tpu.memory_space<vmem>>, vector<1x8x1xf32>
    %49 = vector.shape_cast %48 : vector<1x8x1xf32> to vector<8x1xf32>
    %50 = vector.shape_cast %47 : vector<8x1xf32> to vector<1x8x1xf32>
    tpu.vector_store %arg4[%c1_24, %c0_25, %c0_26], %50 {strides = array<i32>} : memref<2x8x1xf32, #tpu.memory_space<vmem>>, vector<1x8x1xf32>,
    return
  }
  func.func @transform_0(%arg0: i32) -> (i32, i32, i32) {
    %c0_i32 = arith.constant 0 : i32
    %c0_i32_0 = arith.constant 0 : i32
    %c0_i32_1 = arith.constant 0 : i32
    return %arg0, %c0_i32, %c0_i32_0 : i32, i32, i32
  }
  func.func @transform_1(%arg0: i32) -> (i32, i32) {
    %c0_i32 = arith.constant 0 : i32
    %c0_i32_0 = arith.constant 0 : i32
    %c0_i32_1 = arith.constant 0 : i32
    return %c0_i32, %c0_i32_0 : i32, i32
  }
  func.func @transform_2(%arg0: i32) -> (i32, i32, i32) {
    %c0_i32 = arith.constant 0 : i32
    %c0_i32_0 = arith.constant 0 : i32
    %c0_i32_1 = arith.constant 0 : i32
    return %arg0, %c0_i32, %c0_i32_0 : i32, i32, i32
  }
  func.func @transform_3(%arg0: i32) -> (i32, i32, i32) {
    %c0_i32 = arith.constant 0 : i32
    %c0_i32_0 = arith.constant 0 : i32
    %c0_i32_1 = arith.constant 0 : i32
    return %arg0, %c0_i32, %c0_i32_0 : i32, i32, i32
  }
}

</mosaic_0001>

<bundles_post_ra>
// kernel: tpu_custom_call.1
= control target key start
LH: loop header
LB: loop body
LE: loop exit
PB: predicated region body
PF: predicated region fallthrough
CT: control target
= control target key end

     0   :  { %9 = vsyncpa [#allocation3], 0  ;;  %s361_s0 = inlined_call_operand.hbm [shape: f32[2,4,16], index: 0, kind: input, shape index: {}]   ;;  %s362_s1 = inlined_call_operand.hbm [shape: bf16[8,12], index: 1, kind: input, shape index: {}]   ;;  %s363_s2 = inlined_call_operand.vmem [shape: f32[2,8,1], index: 2, kind: output, shape index: {0}]   ;;  %s364_s3 = inlined_call_operand.vmem [shape: f32[2,8,1], index: 3, kind: output, shape index: {1}]  }
   0x1   :  { %10 = vsyncpa [#allocation5], 0  ;;  %s286_s12 = smov [#allocation2]   ;;  %s238_s16 = scalar_lea.hbm %s361_s0, 128 }
   0x2   :  { %s16_s13 = sshll.u32 %s286_s12, 4  ;;  %p239_p0 = scmp.ne.s32.totalorder %s361_s0, %s238_s16  ;;  %s17_s13 = int_to_ptr.vmem [resolvable:$true] %s16_s13 }
   0x3   :  { %p242_p1 = scmp.lt.u32.totalorder %s238_s16, %s361_s0 }
   0x5   :  { %p244_p2 = pnand %p242_p1, %p239_p0 }
   0x7   :  { %247 = shalt.err (!%p244_p2)
}
   0x8   :  { %s248_s21 = scalar_lea.vmem %s17_s13, 128  ;;  %p253_p4 = scmp.lt.s32.totalorder %s17_s13, %s17_s13 }
   0x9   :  { %p249_p3 = scmp.ne.s32.totalorder %s17_s13, %s248_s21  ;;  %p254_p5 = scmp.lt.s32.totalorder %s248_s21, %s248_s21 }
   0xb   :  { %p255_p6 = por %p254_p5, %p253_p4 }
   0xd   :  { %p256_p7 = pnand %p255_p6, %p249_p3 }
   0xf   :  { %259 = shalt.err (!%p256_p7)
}
  0x10   :  { %s287_s22 = smov 64   ;;  %s288_s23 = smov 4  }
  0x11   :  { %22 = dma.hbm_to_vmem [thread:$0]  %s361_s0, 128, %s17_s13, [#allocation3], %s287_s22, %s287_s22, %s288_s23  }
  0x12   :  { %s289_s26 = smov [#allocation4]   ;;  %s260_s30 = scalar_lea.hbm %s362_s1, 64 }
  0x13   :  { %s29_s27 = sshll.u32 %s289_s26, 4  ;;  %p261_p8 = scmp.ne.s32.totalorder %s362_s1, %s260_s30  ;;  %s30_s27 = int_to_ptr.vmem [resolvable:$true] %s29_s27 }
  0x14   :  { %p264_p9 = scmp.lt.u32.totalorder %s260_s30, %s362_s1 }
  0x16   :  { %p266_p10 = pnand %p264_p9, %p261_p8 }
  0x18   :  { %269 = shalt.err (!%p266_p10)
}
  0x19   :  { %s270_s8 = scalar_lea.vmem %s30_s27, 64  ;;  %p275_p12 = scmp.lt.s32.totalorder %s30_s27, %s30_s27 }
  0x1a   :  { %p271_p11 = scmp.ne.s32.totalorder %s30_s27, %s270_s8  ;;  %p276_p13 = scmp.lt.s32.totalorder %s270_s8, %s270_s8 }
  0x1c   :  { %p277_p0 = por %p276_p13, %p275_p12 }
  0x1e   :  { %p278_p1 = pnand %p277_p0, %p271_p11 }
  0x20   :  { %281 = shalt.err (!%p278_p1)
}
  0x21   :  { %32 = dma.hbm_to_vmem [thread:$0]  %s362_s1, 64, %s30_s27, [#allocation5]  }
  0x22   :  { %282 = dma.done.wait [#allocation3], 128  }
  0x23   :  { %283 = vsyncadd [#allocation3], 4294967168 }
  0x24   :  { %284 = dma.done.wait [#allocation5], 64  }
  0x25   :  { %285 = vsyncadd [#allocation5], 4294967232  ;;  %v41_v0 = vld [vmem:[#allocation2] sm:$0xf]  ;;  %v125_v1 = vld [vmem:[#allocation2 + $0x4] sm:$0xf] }
  0x26   :  { %v42_v2 = vpack.c.bf16 %v41_v0, %v41_v0  ;;  %s290_s10 = smov 1   ;;  %v126_v3 = vpack.c.bf16 %v125_v1, %v125_v1  ;;  %v291_v4 = vmov 0.0   ;;  %vm292_vm0 = vmmov 0   ;;  %s293_s1 = smov 126   ;;  %v40_v21 = vld [vmem:[#allocation4] sm:$0xf] }
  0x27   :  { %217 = vmatprep.subr.bf16.mxu0 %v291_v4  ;;  %223 = vmatprep.subr.bf16.mxu1 %v291_v4  ;;  %vm46_vm1 = vcmask 7168   ;;  %vm50_vm2 = vcmask 138240   ;;  %s294_s11 = smov 127   ;;  %vm59_vm3 = vcmask 1041408   ;;  %vm62_vm4 = vcmask 1043456  }
  0x28   :  { %44 = vrot.lane.b32.xlu0 %v42_v2, %s290_s10  ;;  %219 = vmatprep.mubr.msk.bf16.mxu0 %vm292_vm0, %v291_v4  ;;  %vm69_vm5 = vcmask 1045504   ;;  %vm65_vm6 = vcmask 97280   ;;  %vm112_vm7 = vcmask 130048  }
  0x29   :  { %225 = vmatprep.mubr.msk.bf16.mxu1 %vm292_vm0, %v291_v4 }
  0x2c   :  { %128 = vrot.lane.b32.xlu0 %v126_v3, %s290_s10 }
  0x9a   :  { %v45_v5 = vpop.permute.xlu0 %44 }
  0x9b   :  { %v49_v6 = vsel %vm46_vm1, 0, %v45_v5 }
  0x9c   :  { %v51_v7 = vsel %vm50_vm2, %v49_v6, 0 }
  0x9d   :  { %v56_v8 = vrot.slane %v51_v7, 4  ;;  %v53_v9 = vrot.slane %v51_v7, 6 }
  0x9e   :  { %v129_v10 = vpop.permute.xlu0 %128 }
  0x9f   :  { %v131_v11 = vsel %vm46_vm1, 0, %v129_v10  ;;  %57 = vrot.lane.b32.xlu0 %v56_v8, %s293_s1  ;;  %54 = vrot.lane.b32.xlu1 %v53_v9, %s294_s11 }
  0xa0   :  { %v132_v12 = vsel %vm50_vm2, %v131_v11, 0 }
  0xa1   :  { %v134_v13 = vrot.slane %v132_v12, 6  ;;  %v137_v14 = vrot.slane %v132_v12, 4 }
  0xa3   :  { %135 = vrot.lane.b32.xlu1 %v134_v13, %s294_s11 }
  0xa7   :  { %138 = vrot.lane.b32.xlu1 %v137_v14, %s293_s1 }
 0x111   :  { %v55_v15 = vpop.permute.xlu1 %54  ;;  %v58_v16 = vpop.permute.xlu0 %57 }
 0x112   :  { %v61_v17 = vsel %vm59_vm3, %v51_v7, %v55_v15 }
 0x113   :  { %v64_v18 = vsel %vm62_vm4, %v61_v17, %v58_v16 }
 0x114   :  { %v70_v19 = vsel %vm69_vm5, %v64_v18, 0 }
 0x115   :  { %v136_v20 = vpop.permute.xlu1 %135  ;;  %218 = vmatpush3.bf16.msra.mxu0 %v70_v19 }
 0x116   :  { %v141_v22 = vsel %vm59_vm3, %v132_v12, %v136_v20 }
 0x118   :  { %220 = vmatmul.mubr.msk.bf16.vlgmr.msra.gmra.mrb[0].mxu0 %vm65_vm6, %v40_v21 }
 0x119   :  { %v139_v23 = vpop.permute.xlu1 %138 }
 0x11a   :  { %v143_v24 = vsel %vm62_vm4, %v141_v22, %v139_v23 }
 0x11b   :  { %v144_v25 = vsel %vm69_vm5, %v143_v24, 0 }
 0x11c   :  { %224 = vmatpush3.bf16.msra.mxu1 %v144_v25 }
 0x11f   :  { %226 = vmatmul.mubr.msk.bf16.vlgmr.msra.gmra.mrb[0].mxu1 %vm65_vm6, %v40_v21 }
 0x1eb   :  { %v106_v26 = vpop.f32.mrb[0].mxu0 }
 0x1ec   :  { %v221_v27 = vpop.f32.mrb[1].mxu0  ;;  %v113_v28 = vsel %vm112_vm7, %v106_v26, 0.0 }
 0x1ed   :  { %114 = vadd.xlane.f32.xlu0 %v113_v28  ;;  %v109_v29 = vpop.f32.mrb[2].mxu0 }
 0x1ee   :  { %v222_v30 = vpop.f32.mrb[3].mxu0 }
 0x1f2   :  { %v180_v31 = vpop.f32.mrb[0].mxu1 }
 0x1f3   :  { %v227_v32 = vpop.f32.mrb[1].mxu1  ;;  %v186_v33 = vsel %vm112_vm7, %v180_v31, 0.0 }
 0x1f4   :  { %187 = vadd.xlane.f32.xlu1 %v186_v33  ;;  %v183_v34 = vpop.f32.mrb[2].mxu1 }
 0x1f5   :  { %v228_v35 = vpop.f32.mrb[3].mxu1 }
 0x27a   :  { %v115_v36 = vpop.xlane.xlu0 %114 }
 0x27b   :  { %v116_v37 = vmul.f32 0.0625, %v115_v36 }
 0x27d   :  { %v117_v38 = vsub.f32 %v106_v26, %v116_v37  ;;  %118 = vst.msk [vmem:[%s363_s2] sm:$0xff] %vm46_vm1, %v116_v37 }
 0x27f   :  { %v119_v39 = vmul.f32 %v117_v38, %v117_v38 }
 0x281   :  { %v188_v40 = vpop.xlane.xlu1 %187  ;;  %v120_v41 = vsel %vm112_vm7, %v119_v39, 0.0 }
 0x282   :  { %v189_v42 = vmul.f32 0.0625, %v188_v40  ;;  %121 = vadd.xlane.f32.xlu0 %v120_v41 }
 0x284   :  { %v190_v43 = vsub.f32 %v180_v31, %v189_v42  ;;  %211 = vst.msk [vmem:[%s363_s2 + $0x8] sm:$0xff] %vm46_vm1, %v189_v42 }
 0x286   :  { %v193_v44 = vmul.f32 %v190_v43, %v190_v43 }
 0x288   :  { %v194_v45 = vsel %vm112_vm7, %v193_v44, 0.0 }
 0x289   :  { %195 = vadd.xlane.f32.xlu0 %v194_v45 }
 0x30f   :  { %v122_v46 = vpop.xlane.xlu0 %121 }
 0x310   :  { %123 = vst.msk [vmem:[%s364_s3] sm:$0xff] %vm46_vm1, %v122_v46 }
 0x316   :  { %v196_v47 = vpop.xlane.xlu0 %195 }
 0x317   :  { %212 = vst.msk [vmem:[%s364_s3 + $0x8] sm:$0xff] %vm46_vm1, %v196_v47 }
 0x318   :  { %207 = vsyncpa [#allocation3], 1 }
 0x319   :  { %208 = vsyncpa [#allocation5], 1 }

</bundles_post_ra>
